<compile_context>
chip_gen: v6e
topology: v6e:2x2x1
jax: 0.10.0
libtpu: 0.0.40
codegen_flags: <defaults>
</compile_context>

<pallas_src>
import jax
import jax.numpy as jnp
from jax.experimental import pallas as pl
from jax.experimental.pallas import tpu as pltpu


def _pair(v):
    return (v, v) if isinstance(v, int) else tuple(v)


def _round_up(a, b):
    return -(-a // b) * b


def _sublane_pack(itemsize):
    # Sub-32-bit dtypes pack along sublanes: 8 rows for f32, 16 for bf16, 32 for int8/fp8.
    return max(32 // itemsize, 8)


def _vmem_budgets():
    """(double-buffered working-set budget, Mosaic vmem_limit_bytes), per generation."""
    try:
        cap = pltpu.get_tpu_info().vmem_capacity_bytes
    except Exception:
        cap = 128 * 1024 * 1024                          # conservative v5e/v6e default
    work_budget = min(20 * 1024 * 1024, cap // 5)        # ~20 MiB @128 MiB, ~12.8 MiB @64 MiB
    vmem_limit = min((3 * cap) // 4, 64 * 1024 * 1024)   # 64 MiB v5e/v6e, 48 MiB v7x
    return work_budget, vmem_limit


# --------------------------------------------------------------------------------------
# Kernels
# --------------------------------------------------------------------------------------
def _nonoverlap_pool_kernel(x_ref, o_ref):
    """Non-overlapping (kernel == stride) channel/height max pool.

    x_ref: (Mt, kc, H_out, kh*W) -- natural NCHW layout after a free reshape.
    o_ref: (Mt, H_out, W)        -- max over the kc slabs and the kh lane sub-blocks.

    Only leading-axis integer indexing, static lane slices and element-wise maximum are
    used (no reshapes, no strided ref windows); all of it is VPU/XLU work hidden under
    the HBM-bound input DMA.
    """
    kc = x_ref.shape[1]
    w = o_ref.shape[-1]
    kh = x_ref.shape[-1] // w

    v = x_ref[:, 0, :, :]                         # (Mt, H_out, kh*W)
    for dc in range(1, kc):                       # static unroll; kc is tiny
        v = jnp.maximum(v, x_ref[:, dc, :, :])

    acc = v[:, :, 0:w]                            # (Mt, H_out, W)
    for dh in range(1, kh):                       # static unroll; kh is tiny
        acc = jnp.maximum(acc, v[:, :, dh * w:(dh + 1) * w])
    o_ref[...] = acc


def _window_major_max_kernel(x_ref, o_ref):
    """Fallback kernel: elementwise max over a leading window axis.

    x_ref: (KW, Mt, Lt); o_ref: (Mt, Lt).  Bounded live range: one slab at a time.
    """
    acc = x_ref[0]
    for k in range(1, x_ref.shape[0]):
        acc = jnp.maximum(acc, x_ref[k])
    o_ref[...] = acc


# --------------------------------------------------------------------------------------
# Tiling helpers
# --------------------------------------------------------------------------------------
def _choose_mt_nonoverlap(m, kc, h_out, khw, w, itemsize, budget):
    """Rows per grid step, sized against the *padded* VMEM footprint."""
    sub = _sublane_pack(itemsize)
    pin = kc * _round_up(h_out, sub) * _round_up(khw, 128) * itemsize
    pout = _round_up(h_out, sub) * _round_up(w, 128) * itemsize
    mt = max(budget // (2 * (pin + pout)), 1)            # 2x: double-buffered in + out
    # v7x has 2 TensorCores: keep >= 2 (ideally >= 4) "parallel" grid steps.
    target_steps = 4 if m >= 8 else (2 if m >= 2 else 1)
    mt = min(mt, pl.cdiv(m, target_steps))
    return max(min(mt, m), 1)


def _choose_tiles_window_major(kw, m, l, itemsize, budget):
    """(Mt, Lt) for the fallback path: lane-dense, dtype-aware sublane rounding."""
    pack = _sublane_pack(itemsize)
    lt = l if l <= 4096 else 4096                         # 4096 is a multiple of 128
    denom = 2 * (kw + 1) * lt * itemsize                  # double-buffered inputs + output
    mt = max(budget // denom, pack)
    if mt >= m:
        mt = m                                            # full extent: always legal
    else:
        mt = max((mt // pack) * pack, pack)
    return mt, lt


# --------------------------------------------------------------------------------------
# Wrapper
# --------------------------------------------------------------------------------------
def channel_max_pooling(x, kernel_size, stride):
    """Pallas implementation of Channel_Max_Pooling.forward (minus the prints)."""
    kh, kc = _pair(kernel_size)         # window over (H, C) of the transposed tensor
    sh, sc = _pair(stride)
    N, C, H, W = x.shape
    C_out = (C - kc) // sc + 1
    H_out = (H - kh) // sh + 1
    assert C_out >= 1 and H_out >= 1, "pool window larger than input"

    M = N * C_out
    work_budget, vmem_limit = _vmem_budgets()

    if sc == kc and sh == kh:
        # ---- fast path: the module's kernel_size == stride configuration --------------
        # Crop the unused tail (a no-op when C, H divide) and free-reshape the NCHW input
        # to (M, kc, H_out, kh*W).  No HBM transpose: the window reduction is in-kernel.
        C_used, H_used = C_out * kc, H_out * kh
        xc = x if (C_used == C and H_used == H) else x[:, :C_used, :H_used, :]
        khw = kh * W
        xw = xc.reshape(M, kc, H_out, khw)

        Mt = _choose_mt_nonoverlap(M, kc, H_out, khw, W, x.dtype.itemsize, work_budget)
        out3d = pl.pallas_call(
            _nonoverlap_pool_kernel,
            out_shape=jax.ShapeDtypeStruct((M, H_out, W), x.dtype),
            grid=(pl.cdiv(M, Mt),),
            in_specs=[pl.BlockSpec((Mt, kc, H_out, khw), lambda i: (i, 0, 0, 0))],
            out_specs=pl.BlockSpec((Mt, H_out, W), lambda i: (i, 0, 0)),
            compiler_params=pltpu.CompilerParams(
                dimension_semantics=("parallel",),
                vmem_limit_bytes=vmem_limit),
        )(xw)
        # TODO(synk): output stores are W-lane masked (W < 128 for CIFAR GhostNet); making
        # them 128-lane dense would need an in-kernel sublane->lane merge reshape.
        return out3d.reshape(N, C_out, H_out, W)

    # ---- general / overlapping windows (unused by the module's config) ----------------
    # TODO(synk): this path still gathers the kc*kh window slabs wrapper-side (~KW x the
    # roofline read traffic); Mosaic cannot cleanly express strided ref windows on these
    # axes, so the gather stays in XLA for this configuration.
    KW = kc * kh
    L = H_out * W
    slabs = []
    for dc in range(kc):
        for dh in range(kh):
            slabs.append(jax.lax.slice(
                x,
                (0, dc, dh, 0),
                (N, dc + (C_out - 1) * sc + 1, dh + (H_out - 1) * sh + 1, W),
                (1, sc, sh, 1)))
    xw = jnp.stack(slabs, axis=0).reshape(KW, M, L)       # free reshape, window-major

    Mt, Lt = _choose_tiles_window_major(KW, M, L, x.dtype.itemsize, work_budget)
    out2d = pl.pallas_call(
        _window_major_max_kernel,
        out_shape=jax.ShapeDtypeStruct((M, L), x.dtype),
        grid=(pl.cdiv(M, Mt), pl.cdiv(L, Lt)),
        in_specs=[pl.BlockSpec((KW, Mt, Lt), lambda i, j: (0, i, j))],
        out_specs=pl.BlockSpec((Mt, Lt), lambda i, j: (i, j)),
        compiler_params=pltpu.CompilerParams(
            dimension_semantics=("parallel", "parallel"),
            vmem_limit_bytes=vmem_limit),
    )(xw)
    return out2d.reshape(N, C_out, H_out, W)


def channel_max_pooling_ref(x, kernel_size, stride):
    """Pure-JAX reference mirroring the PyTorch forward exactly (float dtypes only:
    reduce_window is seeded with -inf)."""
    kh, kc = _pair(kernel_size)
    sh, sc = _pair(stride)
    xt = jnp.transpose(x, (0, 3, 2, 1))                   # (N, W, H, C)
    pooled = jax.lax.reduce_window(
        xt, -jnp.inf, jax.lax.max,
        window_dimensions=(1, 1, kh, kc),
        window_strides=(1, 1, sh, sc),
        padding="VALID",
    )
    return jnp.transpose(pooled, (0, 3, 2, 1))            # (N, C_out, H_out, W)


if __name__ == "__main__":
    key = jax.random.PRNGKey(0)
    f = jax.jit(channel_max_pooling, static_argnums=(1, 2))

    # Primary case: Channel_Max_Pooling(kernel_size=2, stride=2), the module's config.
    x = jax.random.normal(key, (2, 4, 16, 16), dtype=jnp.float32)   # NCHW
    out = jax.block_until_ready(f(x, 2, 2))
    ref = channel_max_pooling_ref(x, 2, 2)
    assert out.shape == ref.shape == (2, 2, 8, 16), (out.shape, ref.shape)
    assert out.dtype == x.dtype
    assert jnp.allclose(out, ref), "mismatch vs reference (kernel=stride=2)"

    # Secondary case: overlapping windows (kernel=3, stride=2) exercises the fallback.
    x2 = jax.random.normal(jax.random.PRNGKey(0), (2, 5, 9, 16), dtype=jnp.float32)
    out2 = jax.block_until_ready(f(x2, 3, 2))
    ref2 = channel_max_pooling_ref(x2, 3, 2)
    assert out2.shape == ref2.shape == (2, 2, 4, 16), (out2.shape, ref2.shape)
    assert jnp.allclose(out2, ref2), "mismatch vs reference (kernel=3, stride=2)"

    print("KERNEL_OK")
</pallas_src>

<mosaic_0001>
module attributes {stable_mosaic.version = 11 : i64} {
  func.func @_nonoverlap_pool_kernel(%arg0: i32, %arg1: memref<2x2x8x32xf32, #tpu.memory_space<vmem>>, %arg2: memref<2x8x16xf32, #tpu.memory_space<vmem>>) attributes {dimension_semantics = [#tpu.dimension_semantics<parallel>], iteration_bounds = array<i64: 2>, scalar_prefetch = 0 : i64, scratch_operands = 0 : i64, tpu.core_type = #tpu.core_type<tc>, window_params = [{transform_indices = @transform_0, window_bounds = array<i64: 2, 2, 8, 32>}, {transform_indices = @transform_1, window_bounds = array<i64: 2, 8, 16>}]} {
    %c0 = arith.constant 0 : index
    %c0_0 = arith.constant 0 : index
    %c0_1 = arith.constant 0 : index
    %c0_2 = arith.constant 0 : index
    %0 = vector.load %arg1[%c0, %c0_0, %c0_1, %c0_2] : memref<2x2x8x32xf32, #tpu.memory_space<vmem>>, vector<2x1x8x32xf32>
    %1 = vector.shape_cast %0 : vector<2x1x8x32xf32> to vector<2x8x32xf32>
    %c0_3 = arith.constant 0 : index
    %c1 = arith.constant 1 : index
    %c0_4 = arith.constant 0 : index
    %c0_5 = arith.constant 0 : index
    %2 = vector.load %arg1[%c0_3, %c1, %c0_4, %c0_5] : memref<2x2x8x32xf32, #tpu.memory_space<vmem>>, vector<2x1x8x32xf32>
    %3 = vector.shape_cast %2 : vector<2x1x8x32xf32> to vector<2x8x32xf32>
    %4 = arith.maximumf %1, %3 : vector<2x8x32xf32>
    %5 = vector.extract_strided_slice %4 {offsets = [0, 0, 0], sizes = [2, 8, 16], strides = [1, 1, 1]} : vector<2x8x32xf32> to vector<2x8x16xf32>
    %6 = vector.extract_strided_slice %4 {offsets = [0, 0, 16], sizes = [2, 8, 16], strides = [1, 1, 1]} : vector<2x8x32xf32> to vector<2x8x16xf32>
    %7 = arith.maximumf %5, %6 : vector<2x8x16xf32>
    %c0_6 = arith.constant 0 : index
    %c0_7 = arith.constant 0 : index
    %c0_8 = arith.constant 0 : index
    %8 = vector.load %arg2[%c0_6, %c0_7, %c0_8] : memref<2x8x16xf32, #tpu.memory_space<vmem>>, vector<2x8x16xf32>
    tpu.vector_store %arg2[%c0_6, %c0_7, %c0_8], %7 {strides = array<i32>} : memref<2x8x16xf32, #tpu.memory_space<vmem>>, vector<2x8x16xf32>,
    return
  }
  func.func @transform_0(%arg0: i32) -> (i32, i32, i32, i32) {
    %c0_i32 = arith.constant 0 : i32
    %c0_i32_0 = arith.constant 0 : i32
    %c0_i32_1 = arith.constant 0 : i32
    %c0_i32_2 = arith.constant 0 : i32
    return %arg0, %c0_i32, %c0_i32_0, %c0_i32_1 : i32, i32, i32, i32
  }
  func.func @transform_1(%arg0: i32) -> (i32, i32, i32) {
    %c0_i32 = arith.constant 0 : i32
    %c0_i32_0 = arith.constant 0 : i32
    %c0_i32_1 = arith.constant 0 : i32
    return %arg0, %c0_i32, %c0_i32_0 : i32, i32, i32
  }
}

</mosaic_0001>

<bundles_post_ra>
// kernel: channel_max_pooling.1
= control target key start
LH: loop header
LB: loop body
LE: loop exit
PB: predicated region body
PF: predicated region fallthrough
CT: control target
= control target key end

     0   :  { %6 = vsyncpa [#allocation3], 0  ;;  %s453_s0 = inlined_call_operand.vmem [shape: f32[4,2,8,32], index: 0, kind: input, shape index: {}]   ;;  %s454_s1 = inlined_call_operand.hbm [shape: f32[4,8,16], index: 1, kind: output, shape index: {}]  }
   0x1   :  { %8 = vsyncpa [#allocation3 + $0x1], 0  ;;  %s352_s6 = smov 0   ;;  %s354_s7 = smov 0  }
   0x2   :  { %s356_s8 = smov 0   ;;  %s358_s9 = smov 0  }
   0x3 LB: > { %s373_s10 = sadd.s32 4294967295, %s336_s9   ;;  %s217_s11 = sadd.s32 4294967294, %s336_s9   ;;  %s336_s9 = sphi %s358_s9, %s460_s9   ;;  %s332_s8 = sphi %s356_s8, %s459_s8   ;;  %s328_s7 = sphi %s354_s7, %s458_s7   ;;  %s324_s6 = sphi %s352_s6, %s457_s6  }
   0x4   : > { %s377_s12 = sadd.s32 1, %s336_s9   ;;  %s47_s13 = sadd.s32 1, %s332_s8 }
   0x5   : > { %s44_s14 = ssub.s32 %s336_s9, %s377_s12  ;;  %p57_p0 = scmp.ne.s32.totalorder %s332_s8, %s328_s7 }
   0x6   : > { %p45_p1 = scmp.eq.s32.totalorder %s44_s14, 0  ;;  %p58_p2 = scmp.eq.s32.totalorder %s373_s10, 1 }
   0x7   : > { %p63_p3 = scmp.ne.s32.totalorder %s328_s7, %s324_s6  ;;  %p64_p4 = scmp.eq.s32.totalorder %s217_s11, 1 }
   0x8   : > { %s388_s15 = scalar_select %p45_p1, %s332_s8, %s47_s13  }
   0x9   : > { %p390_p5 = por %p58_p2, %p57_p0  ;;  %p394_p6 = por %p64_p4, %p63_p3 }
   0xa   : > { %p220_p7 = scmp.ge.s32.totalorder %s336_s9, 1  ;;  %p92_p8 = scmp.lt.s32.totalorder %s336_s9, 3 }
   0xc   : > { %p93_p9 = pnand %p220_p7, %p92_p8 }
   0xd   : > { %s222_s18 = sshll.u32 (!%p93_p9), %s373_s10, 1  ;;  %s338_s23 = smov (!%p93_p9), 112  }
   0xe   : > { %96 = sbr.rel (%p93_p9) target bundleno = 160 (0xa0), region = 24  ;;  %p114_p10 = scmp.lt.s32.totalorder (!%p93_p9), %s222_s18, 3 }
   0xf   : > { %s110_s24 = sand.u32 (!%p93_p9), 1, %s328_s7   ;;  %s233_s28 = sshll.u32 (!%p93_p9), %s373_s10, 8 }
  0x10   : > { %s221_s25 = sshll.u32 (!%p93_p9), %s110_s24, 4  ;;  %s411_s2 = scalar_lea.hbm (!%p93_p9), %s454_s1, %s233_s28 }
  0x11   : > { %s112_s26 = scalar_lea.vmem (!%p93_p9), [#allocation2], %s221_s25  ;;  %s413_s3 = scalar_lea.sflag (!%p93_p9), [#allocation3], %s110_s24 }
  0x12   : > { %s155_s27 = sshll.u32 (!%p93_p9), %s112_s26, 4  ;;  %s339_s5 = smov (!%p93_p9), [#allocation2]   ;;  %s406_s27 = int_to_ptr.vmem [resolvable:$true] %s155_s27 }
  0x13   : > { %s462_s18 = smov (!%p114_p10, %s222_s18), 3  ;;  %vm138_vm0 = vcmask 130048   ;;  %s276_s4 = scalar_lea.vmem %s406_s27, 256 }
  0x14   : > { %s232_s19 = sshll.u32 %s462_s18, 4  ;;  %p277_p11 = scmp.ne.s32.totalorder %s406_s27, %s276_s4 }
  0x15   : > { %s118_s22 = scalar_lea.vmem %s453_s0, %s232_s19  ;;  %s280_s10 = sshll.u32 %s339_s5, 4  ;;  %s281_s10 = int_to_ptr.vmem [resolvable:$false] %s280_s10 }
  0x16   : > { %v121_v0 = vld [vmem:[%s118_s22] sm:$0xff]  ;;  %v225_v1 = vld [vmem:[%s118_s22 + $0x8] sm:$0xff]  ;;  %v122_v2 = vld [vmem:[%s118_s22 + $0x10] sm:$0xff]  ;;  %p278_p12 = pnand %p277_p11, %p390_p5  ;;  %s282_s11 = scalar_lea.vmem %s281_s10, 512 }
  0x17   : > { %v126_v3 = vmax.f32 %v121_v0, %v225_v1  ;;  %v226_v4 = vld [vmem:[%s118_s22 + $0x18] sm:$0xff]  ;;  %p283_p0 = scmp.lt.s32.totalorder %s406_s27, %s281_s10  ;;  %p284_p1 = scmp.lt.s32.totalorder %s282_s11, %s276_s4 }
  0x18   : > { %v127_v5 = vmax.f32 %v122_v2, %v226_v4  ;;  %p279_p13 = pneg %p278_p12 }
  0x19   : > { %130 = vrot.lane.b32.xlu0 %v126_v3, %s338_s23  ;;  %p285_p2 = por %p284_p1, %p283_p0 }
  0x1b   : > { %p286_p3 = pnand %p285_p2, %p279_p13 }
  0x1d   : > { %132 = vrot.lane.b32.xlu0 %v127_v5, %s338_s23 }
  0x8b   : > { %v131_v6 = vpop.permute.xlu0 %130 }
  0x8c   : > { %v136_v7 = vmax.f32 %v126_v3, %v131_v6 }
  0x8e   : > { %139 = vst.msk [vmem:[%s112_s26] sm:$0xff] %vm138_vm0, %v136_v7 }
  0x8f   : > { %v133_v8 = vpop.permute.xlu0 %132 }
  0x90   : > { %v137_v9 = vmax.f32 %v127_v5, %v133_v8 }
  0x92   : > { %140 = vst.msk [vmem:[%s112_s26 + $0x8] sm:$0xff] %vm138_vm0, %v137_v9 }
  0x93   : > { %289 = shalt.err (!%p286_p3)
}
  0x94   : > { %s290_s13 = scalar_lea.hbm %s411_s2, 256  ;;  %s294_s19 = scalar_lea.hbm %s454_s1, 512 }
  0x95   : > { %p291_p4 = scmp.ne.s32.totalorder %s411_s2, %s290_s13  ;;  %p295_p9 = scmp.lt.s32.totalorder %s411_s2, %s454_s1 }
  0x96   : > { %p296_p10 = scmp.lt.s32.totalorder %s294_s19, %s290_s13 }
  0x97   : > { %p292_p7 = pnand %p291_p4, %p390_p5 }
  0x98   : > { %p297_p11 = por %p296_p10, %p295_p9 }
  0x99   : > { %p293_p8 = pneg %p292_p7 }
  0x9b   : > { %p298_p12 = pnand %p297_p11, %p293_p8 }
  0x9d   : > { %301 = shalt.err (!%p298_p12)
}
  0x9e   : > { %s340_s22 = smov 128   ;;  %s341_s23 = smov 8  }
  0x9f   : > { %234 = dma.vmem_to_hbm [thread:$0]  (%p390_p5), %s406_s27, 256, %s411_s2, %s413_s3, %s340_s22, %s340_s22, %s341_s23  }
  0xa0 PF: > { %p240_p13 = scmp.ge.s32.totalorder %s336_s9, 2  ;;  %s170_s24 = sand.u32 1, %s324_s6  }
  0xa1   : > { %s171_s25 = scalar_lea.sflag [#allocation3], %s170_s24 }
  0xa2   : > { %p237_p0 = pnand %p240_p13, %p394_p6 }
  0xa4   : > { %p238_p1 = pneg %p237_p0 }
  0xa6   : > { %319 = dma.done.wait (%p238_p1), %s171_s25, 256  }
  0xa7   : > { %321 = vsyncadd (%p238_p1), %s171_s25, 4294967040  ;;  %p11_p2 = scmp.ge.s32.totalorder %s377_s12, 4   ;;  %s457_s6 = smov %s328_s7 }
  0xa8   : > { %s458_s7 = smov %s332_s8  ;;  %s459_s8 = smov %s388_s15 }
  0xa9   : > { %s460_s9 = smov %s377_s12  ;;  %13 = sbr.rel (!%p11_p2) target bundleno = 3 (0x3), region = 60 }
  0xae   :  { %176 = vsyncpa [#allocation3], 1 }
  0xaf   :  { %178 = vsyncpa [#allocation3 + $0x1], 1 }

</bundles_post_ra>
